<compile_context>
chip_gen: v5e
topology: v5e:2x2
jax: 0.10.0
libtpu: 0.0.40
codegen_flags: <defaults>
</compile_context>

<pallas_src>
import functools

import numpy as np
import jax
import jax.numpy as jnp
from jax.experimental import pallas as pl
from jax.experimental.pallas import tpu as pltpu


_TK_MAX = 512  # largest single-block K; every layer of this model fits in one K step.


def _round_up(n, m):
    return ((n + m - 1) // m) * m


@functools.lru_cache(maxsize=None)
def _vmem_limit_bytes():
    # v5e/v6e have 128 MiB VMEM, v7x only 64 MiB -> derive the scoped limit from hardware
    # when the query is available, otherwise fall back to a value safe on every generation.
    try:
        cap = int(pltpu.get_tpu_info().vmem_capacity_bytes)
    except Exception:
        cap = 64 * 1024 * 1024
    return max(32 * 1024 * 1024, min(cap // 2, 96 * 1024 * 1024))


# ----------------------------------------------------------------------------
# Pallas kernels
# ----------------------------------------------------------------------------
def _matmul_bias_relu_k1_kernel(x_ref, w_ref, b_ref, o_ref):
    # Single K step: no accumulator scratch, no init/finalize passes.
    y = jnp.dot(x_ref[...], w_ref[...], preferred_element_type=jnp.float32)
    o_ref[...] = jnp.maximum(y + b_ref[...], 0.0).astype(o_ref.dtype)


def _matmul_bias_relu_acc_kernel(x_ref, w_ref, b_ref, o_ref, acc_ref):
    # Generic K-tiled path (K > _TK_MAX): accumulator starts at the broadcast bias so the
    # finalize step is just relu + cast (one fewer full VPU pass over the tile).
    @pl.when(pl.program_id(2) == 0)
    def _init():
        acc_ref[...] = jnp.broadcast_to(b_ref[...], acc_ref.shape)

    acc_ref[...] += jnp.dot(x_ref[...], w_ref[...], preferred_element_type=jnp.float32)

    @pl.when(pl.program_id(2) == pl.num_programs(2) - 1)
    def _finalize():
        o_ref[...] = jnp.maximum(acc_ref[...], 0.0).astype(o_ref.dtype)


def _choose_m_tile(m):
    """(padded M, M tile).  Keeps >= 2 M-blocks whenever possible so the 'parallel' M axis
    can be sharded across v7x's two TensorCores; tiles stay small for v7x's 64 MiB VMEM."""
    if m <= 8:
        mp = _round_up(max(m, 1), 8)
        return mp, mp
    mp = _round_up(m, 16)
    if mp <= 1024:
        return mp, mp // 2           # grid_i == 2
    tm = 512
    return _round_up(m, tm), tm


def matmul_bias_relu(patches, w_packed, bias_packed, n_true, out_dtype=jnp.bfloat16):
    """relu(patches @ w + b) on the MXU, bias + ReLU + cast fused in the epilogue.

    patches     : [M, K]   any float dtype (cast to bf16 for the MXU)
    w_packed    : [Kp, Np] bf16, Kp = mult of 16 >= K, Np = mult of 128 >= n_true (lane-dense)
    bias_packed : [1, Np]  f32 (zero in the padded columns)
    returns     : [M, n_true] out_dtype
    """
    m, k = patches.shape
    kp, npad = w_packed.shape
    assert kp >= k and npad >= n_true and npad % 128 == 0

    mp, tm = _choose_m_tile(m)
    tn = 256 if npad % 256 == 0 else 128
    tn = min(tn, npad)

    xp = patches.astype(jnp.bfloat16)
    if (mp, kp) != (m, k):
        xp = jnp.pad(xp, ((0, mp - m), (0, kp - k)))

    out_bytes = mp * npad * np.dtype(out_dtype).itemsize
    cost = pl.CostEstimate(
        flops=2 * mp * kp * npad,
        transcendentals=0,
        bytes_accessed=mp * kp * 2 + kp * npad * 2 + npad * 4 + out_bytes,
    )

    if kp <= _TK_MAX:
        # --- single K step: every layer of this autoencoder takes this path ---
        out = pl.pallas_call(
            _matmul_bias_relu_k1_kernel,
            out_shape=jax.ShapeDtypeStruct((mp, npad), out_dtype),
            grid=(mp // tm, npad // tn),
            in_specs=[
                pl.BlockSpec((tm, kp), lambda i, j: (i, 0)),
                pl.BlockSpec((kp, tn), lambda i, j: (0, j)),
                pl.BlockSpec((1, tn), lambda i, j: (0, j)),
            ],
            out_specs=pl.BlockSpec((tm, tn), lambda i, j: (i, j)),
            compiler_params=pltpu.CompilerParams(
                dimension_semantics=("parallel", "parallel"),
                vmem_limit_bytes=_vmem_limit_bytes(),
            ),
            cost_estimate=cost,
        )(xp, w_packed, bias_packed)
    else:
        # --- generic K-tiled path (not exercised by this model) ---
        tk = _TK_MAX
        kp2 = _round_up(kp, tk)
        if kp2 != kp:
            w_packed = jnp.pad(w_packed, ((0, kp2 - kp), (0, 0)))
            xp = jnp.pad(xp, ((0, 0), (0, kp2 - kp)))
            kp = kp2
        out = pl.pallas_call(
            _matmul_bias_relu_acc_kernel,
            out_shape=jax.ShapeDtypeStruct((mp, npad), out_dtype),
            grid=(mp // tm, npad // tn, kp // tk),
            in_specs=[
                pl.BlockSpec((tm, tk), lambda i, j, kk: (i, kk)),
                pl.BlockSpec((tk, tn), lambda i, j, kk: (kk, j)),
                pl.BlockSpec((1, tn), lambda i, j, kk: (0, j)),
            ],
            out_specs=pl.BlockSpec((tm, tn), lambda i, j, kk: (i, j)),
            scratch_shapes=[pltpu.VMEM((tm, tn), jnp.float32)],
            compiler_params=pltpu.CompilerParams(
                dimension_semantics=("parallel", "parallel", "arbitrary"),
                vmem_limit_bytes=_vmem_limit_bytes(),
            ),
            cost_estimate=cost,
        )(xp, w_packed, bias_packed)

    if mp != m or npad != n_true:
        out = out[:m, :n_true]      # fused with the consumer reshape by XLA
    return out


# ----------------------------------------------------------------------------
# Weight pre-packing (done ONCE, outside the forward hot path)
# ----------------------------------------------------------------------------
def _pad_packed(wk, bias):
    """Pad packed weight [K, N] -> bf16 [mult16(K), mult128(N)] and bias -> f32 [1, mult128(N)].
    N padded to 128 gives lane-dense unmasked output stores; padded columns stay relu(0)=0."""
    k, n = wk.shape
    kp = _round_up(k, 16)
    npad = _round_up(n, 128)
    wkp = jnp.pad(wk, ((0, kp - k), (0, npad - n))).astype(jnp.bfloat16)
    bp = jnp.pad(jnp.asarray(bias, jnp.float32).reshape(1, n), ((0, 0), (0, npad - n)))
    return wkp, bp


def prepack_conv2d(w, b):
    """PyTorch Conv2d weight [Cout, Cin, kH, kW] + bias -> packed weight/bias + metadata."""
    cout, cin, kh, kw = w.shape
    wk = jnp.transpose(w, (2, 3, 1, 0)).reshape(kh * kw * cin, cout)   # K order = (kh, kw, cin)
    wkp, bp = _pad_packed(wk, b)
    return {"w": wkp, "b": bp, "n": cout, "kh": kh, "kw": kw}


def _phase_taps(k, s, crop_before):
    """Sub-pixel tap metadata for one spatial dim of a stride-`s` ConvTranspose followed by the
    TF-SAME crop (crop_before rows removed at the top/left).  For the cropped output index
    o' = s*i + r (phase r in [0, s)):  out[o'] = sum_t w[a_t] * x[i + off_t].
    Returns (min_off, max_off, taps) with taps[r] = [(off_t, a_t), ...]."""
    all_offs, taps = [], []
    for r in range(s):
        o_mod = r + crop_before
        rho = o_mod % s                 # kernel-tap residue class contributing to this phase
        delta = o_mod // s
        n = -(-(k - rho) // s)          # ceil((k - rho) / s) taps
        phase = []
        for t in range(n):
            a = rho + t * s
            off = delta - t
            phase.append((off, a))
            all_offs.append(off)
        taps.append(phase)
    return min(all_offs), max(all_offs), taps


def prepack_convT_subpixel(w, b, stride):
    """PyTorch ConvTranspose2d weight [Cin, Cout, kH, kW] + bias -> sub-pixel packed weight
    [mult16(Uh*Uw*Cin), mult128(s*s*Cout)] bf16 + padded bias + im2col/pixel-shuffle metadata.
    The TF-SAME crop is folded into the phase decomposition."""
    cin, cout, kh, kw = w.shape
    s = stride
    assert kh >= s and kw >= s, "sub-pixel ConvTranspose assumes kernel >= stride"
    min_h, max_h, taps_h = _phase_taps(kh, s, (kh - s) // 2)
    min_w, max_w, taps_w = _phase_taps(kw, s, (kw - s) // 2)
    uh_n, uw_n = max_h - min_h + 1, max_w - min_w + 1

    w_np = np.asarray(w, dtype=np.float32)
    wsub = np.zeros((uh_n, uw_n, cin, s, s, cout), dtype=np.float32)
    for rh in range(s):
        for off_h, ah in taps_h[rh]:
            for rw in range(s):
                for off_w, aw in taps_w[rw]:
                    wsub[off_h - min_h, off_w - min_w, :, rh, rw, :] = w_np[:, :, ah, aw]
    wk = jnp.asarray(wsub.reshape(uh_n * uw_n * cin, s * s * cout))
    bias_t = jnp.tile(jnp.asarray(b, jnp.float32), s * s)   # column order = (rh, rw, cout)
    wkp, bp = _pad_packed(wk, bias_t)
    return {
        "w": wkp, "b": bp, "n": s * s * cout, "cout": cout, "s": s,
        "uh": uh_n, "uw": uw_n,
        "pad_h": (max(0, -min_h), max(0, max_h)),
        "pad_w": (max(0, -min_w), max(0, max_w)),
        "base_h": min_h + max(0, -min_h),
        "base_w": min_w + max(0, -min_w),
    }


# ----------------------------------------------------------------------------
# Glue (plain JAX, NHWC): SAME pad / im2col / pixel-shuffle — PyTorch semantics
# ----------------------------------------------------------------------------
def same_pad_nhwc(x, k, s):
    """TensorFlow 'SAME' padding (extra pixel goes bottom/right), NHWC."""
    _, h, w, _ = x.shape
    out_h, out_w = -(-h // s), -(-w // s)
    pad_h = max((out_h - 1) * s + k - h, 0)
    pad_w = max((out_w - 1) * s + k - w, 0)
    return jnp.pad(x, ((0, 0),
                       (pad_h // 2, pad_h - pad_h // 2),
                       (pad_w // 2, pad_w - pad_w // 2),
                       (0, 0)))


def _im2col_nhwc(x, kh, kw, stride):
    """x: [B, Hp, Wp, C] (already padded).  Returns ([B*Ho*Wo, kh*kw*C], Ho, Wo)."""
    b, hp, wp, c = x.shape
    ho = (hp - kh) // stride + 1
    wo = (wp - kw) // stride + 1
    pieces = [x[:, i:i + stride * ho:stride, j:j + stride * wo:stride, :]
              for i in range(kh) for j in range(kw)]
    patches = jnp.concatenate(pieces, axis=-1)           # [B, Ho, Wo, kh*kw*C]
    return patches.reshape(b * ho * wo, kh * kw * c), ho, wo


def conv2d_samepad_relu_nhwc(x, pack, out_dtype):
    b = x.shape[0]
    kh, kw = pack["kh"], pack["kw"]
    xpad = same_pad_nhwc(x, kh, 2)
    patches, ho, wo = _im2col_nhwc(xpad, kh, kw, 2)
    y = matmul_bias_relu(patches, pack["w"], pack["b"], pack["n"], out_dtype)
    return y.reshape(b, ho, wo, pack["n"])


def conv_transpose2d_samepad_relu_nhwc(x, pack, out_dtype):
    """ConvTranspose2d(stride=s) + TF-SAME crop + ReLU via the sub-pixel decomposition:
    one stride-1 conv on the un-dilated input producing s*s*Cout phase columns, then a
    pixel-shuffle interleave.  No dilated zeros reach the MXU and no post-crop is needed."""
    b, h, w, _ = x.shape
    s = pack["s"]
    ph0, ph1 = pack["pad_h"]
    pw0, pw1 = pack["pad_w"]
    xpad = jnp.pad(x, ((0, 0), (ph0, ph1), (pw0, pw1), (0, 0)))
    bh, bw = pack["base_h"], pack["base_w"]
    pieces = [xpad[:, bh + uh: bh + uh + h, bw + uw: bw + uw + w, :]
              for uh in range(pack["uh"]) for uw in range(pack["uw"])]
    patches = jnp.concatenate(pieces, axis=-1).reshape(b * h * w, -1)
    y = matmul_bias_relu(patches, pack["w"], pack["b"], pack["n"], out_dtype)
    cout = pack["cout"]
    y = y.reshape(b, h, w, s, s, cout)                     # (rh, rw, cout) phase columns
    y = jnp.transpose(y, (0, 1, 3, 2, 4, 5)).reshape(b, s * h, s * w, cout)
    return y


# ----------------------------------------------------------------------------
# ConvAE forward
# ----------------------------------------------------------------------------
def conv_ae_forward(x_nchw, enc_packed, dec_packed):
    """x_nchw: [B, C, H, W] float32 (PyTorch layout). Returns [B, C, H, W] float32."""
    x = jnp.transpose(x_nchw, (0, 2, 3, 1)).astype(jnp.bfloat16)   # NCHW -> NHWC once, bf16
    for pack in enc_packed:                       # SAME pad -> stride-2 conv -> ReLU (fused)
        x = conv2d_samepad_relu_nhwc(x, pack, jnp.bfloat16)
    for li, pack in enumerate(dec_packed):        # convT -> SAME crop -> ReLU (fused, matches
        out_dtype = jnp.float32 if li == len(dec_packed) - 1 else jnp.bfloat16   # PyTorch ref:
        x = conv_transpose2d_samepad_relu_nhwc(x, pack, out_dtype)  # last layer also has ReLU)
    return jnp.transpose(x, (0, 3, 1, 2))                           # NHWC -> NCHW once


def init_params(key, channels, kernels):
    enc_params, dec_params = [], []
    for i in range(1, len(channels)):
        key, k1, k2 = jax.random.split(key, 3)
        cin, cout, k = channels[i - 1], channels[i], kernels[i - 1]
        w = jax.random.normal(k1, (cout, cin, k, k), jnp.float32) * 0.1     # Conv2d layout
        b = jax.random.normal(k2, (cout,), jnp.float32) * 0.1
        enc_params.append((w, b))
    rch = list(reversed(channels))
    rkr = list(reversed(kernels))
    for i in range(len(rch) - 1):
        key, k1, k2 = jax.random.split(key, 3)
        cin, cout, k = rch[i], rch[i + 1], rkr[i]
        w = jax.random.normal(k1, (cin, cout, k, k), jnp.float32) * 0.1     # ConvTranspose2d layout
        b = jax.random.normal(k2, (cout,), jnp.float32) * 0.1
        dec_params.append((w, b))
    return enc_params, dec_params


if __name__ == "__main__":
    channels = [1, 8, 16]      # grayscale input, two encoder / two decoder layers
    kernels = [3, 3]
    B, H, W = 2, 16, 16

    key = jax.random.PRNGKey(0)
    key, kx = jax.random.split(key)
    x = jax.random.normal(kx, (B, channels[0], H, W), jnp.float32)   # NCHW, like PyTorch

    enc_params, dec_params = init_params(key, channels, kernels)
    # pre-pack once, outside the forward hot path
    enc_packed = [prepack_conv2d(w, b) for (w, b) in enc_params]
    dec_packed = [prepack_convT_subpixel(w, b, 2) for (w, b) in dec_params]

    fwd = jax.jit(functools.partial(conv_ae_forward,
                                    enc_packed=enc_packed, dec_packed=dec_packed))
    y = jax.block_until_ready(fwd(x))
    assert y.shape == (B, channels[0], H, W), y.shape
    assert y.dtype == jnp.float32
    print("KERNEL_OK")
</pallas_src>

<mosaic_0001>
module attributes {stable_mosaic.version = 11 : i64} {
  func.func @_matmul_bias_relu_k1_kernel(%arg0: i32, %arg1: i32, %arg2: memref<64x16xbf16, #tpu.memory_space<vmem>>, %arg3: memref<16x128xbf16, #tpu.memory_space<vmem>>, %arg4: memref<1x128xf32, #tpu.memory_space<vmem>>, %arg5: memref<64x128xbf16, #tpu.memory_space<vmem>>) attributes {dimension_semantics = [#tpu.dimension_semantics<parallel>, #tpu.dimension_semantics<parallel>], iteration_bounds = array<i64: 2, 1>, scalar_prefetch = 0 : i64, scratch_operands = 0 : i64, tpu.core_type = #tpu.core_type<tc>, window_params = [{transform_indices = @transform_0, window_bounds = array<i64: 64, 16>}, {transform_indices = @transform_1, window_bounds = array<i64: 16, 128>}, {transform_indices = @transform_2, window_bounds = array<i64: 1, 128>}, {transform_indices = @transform_3, window_bounds = array<i64: 64, 128>}]} {
    %c0 = arith.constant 0 : index
    %c0_0 = arith.constant 0 : index
    %0 = vector.load %arg2[%c0, %c0_0] : memref<64x16xbf16, #tpu.memory_space<vmem>>, vector<64x16xbf16>
    %c0_1 = arith.constant 0 : index
    %c0_2 = arith.constant 0 : index
    %1 = vector.load %arg3[%c0_1, %c0_2] : memref<16x128xbf16, #tpu.memory_space<vmem>>, vector<16x128xbf16>
    %cst = arith.constant dense<0.000000e+00> : vector<64x128xf32>
    %2 = tpu.matmul %0, %1, %cst {dimension_numbers = #tpu.dot_dimension_numbers<[1], [0], [0], [1], [0, 0, 1, 1], [], []>} : vector<64x16xbf16>, vector<16x128xbf16>, vector<64x128xf32> -> vector<64x128xf32>
    %c0_3 = arith.constant 0 : index
    %c0_4 = arith.constant 0 : index
    %3 = vector.load %arg4[%c0_3, %c0_4] : memref<1x128xf32, #tpu.memory_space<vmem>>, vector<1x128xf32>
    %4 = vector.broadcast %3 : vector<1x128xf32> to vector<64x128xf32>
    %5 = arith.addf %2, %4 : vector<64x128xf32>
    %cst_5 = arith.constant 0.000000e+00 : f32
    %6 = vector.broadcast %cst_5 : f32 to vector<64x128xf32>
    %7 = arith.maximumf %5, %6 : vector<64x128xf32>
    %8 = arith.truncf %7 : vector<64x128xf32> to vector<64x128xbf16>
    %c0_6 = arith.constant 0 : index
    %c0_7 = arith.constant 0 : index
    %9 = vector.load %arg5[%c0_6, %c0_7] : memref<64x128xbf16, #tpu.memory_space<vmem>>, vector<64x128xbf16>
    tpu.vector_store %arg5[%c0_6, %c0_7], %8 {strides = array<i32>} : memref<64x128xbf16, #tpu.memory_space<vmem>>, vector<64x128xbf16>,
    return
  }
  func.func @transform_0(%arg0: i32, %arg1: i32) -> (i32, i32) {
    %c0_i32 = arith.constant 0 : i32
    %c0_i32_0 = arith.constant 0 : i32
    return %arg0, %c0_i32 : i32, i32
  }
  func.func @transform_1(%arg0: i32, %arg1: i32) -> (i32, i32) {
    %c0_i32 = arith.constant 0 : i32
    %c0_i32_0 = arith.constant 0 : i32
    return %c0_i32, %arg1 : i32, i32
  }
  func.func @transform_2(%arg0: i32, %arg1: i32) -> (i32, i32) {
    %c0_i32 = arith.constant 0 : i32
    %c0_i32_0 = arith.constant 0 : i32
    return %c0_i32, %arg1 : i32, i32
  }
  func.func @transform_3(%arg0: i32, %arg1: i32) -> (i32, i32) {
    %c0_i32 = arith.constant 0 : i32
    return %arg0, %arg1 : i32, i32
  }
}

module attributes {stable_mosaic.version = 11 : i64} {
  func.func @_matmul_bias_relu_k1_kernel(%arg0: i32, %arg1: i32, %arg2: memref<16x80xbf16, #tpu.memory_space<vmem>>, %arg3: memref<80x128xbf16, #tpu.memory_space<vmem>>, %arg4: memref<1x128xf32, #tpu.memory_space<vmem>>, %arg5: memref<16x128xbf16, #tpu.memory_space<vmem>>) attributes {dimension_semantics = [#tpu.dimension_semantics<parallel>, #tpu.dimension_semantics<parallel>], iteration_bounds = array<i64: 2, 1>, scalar_prefetch = 0 : i64, scratch_operands = 0 : i64, tpu.core_type = #tpu.core_type<tc>, window_params = [{transform_indices = @transform_0, window_bounds = array<i64: 16, 80>}, {transform_indices = @transform_1, window_bounds = array<i64: 80, 128>}, {transform_indices = @transform_2, window_bounds = array<i64: 1, 128>}, {transform_indices = @transform_3, window_bounds = array<i64: 16, 128>}]} {
    %c0 = arith.constant 0 : index
    %c0_0 = arith.constant 0 : index
    %0 = vector.load %arg2[%c0, %c0_0] : memref<16x80xbf16, #tpu.memory_space<vmem>>, vector<16x80xbf16>
    %c0_1 = arith.constant 0 : index
    %c0_2 = arith.constant 0 : index
    %1 = vector.load %arg3[%c0_1, %c0_2] : memref<80x128xbf16, #tpu.memory_space<vmem>>, vector<80x128xbf16>
    %cst = arith.constant dense<0.000000e+00> : vector<16x128xf32>
    %2 = tpu.matmul %0, %1, %cst {dimension_numbers = #tpu.dot_dimension_numbers<[1], [0], [0], [1], [0, 0, 1, 1], [], []>} : vector<16x80xbf16>, vector<80x128xbf16>, vector<16x128xf32> -> vector<16x128xf32>
    %c0_3 = arith.constant 0 : index
    %c0_4 = arith.constant 0 : index
    %3 = vector.load %arg4[%c0_3, %c0_4] : memref<1x128xf32, #tpu.memory_space<vmem>>, vector<1x128xf32>
    %4 = vector.broadcast %3 : vector<1x128xf32> to vector<16x128xf32>
    %5 = arith.addf %2, %4 : vector<16x128xf32>
    %cst_5 = arith.constant 0.000000e+00 : f32
    %6 = vector.broadcast %cst_5 : f32 to vector<16x128xf32>
    %7 = arith.maximumf %5, %6 : vector<16x128xf32>
    %8 = arith.truncf %7 : vector<16x128xf32> to vector<16x128xbf16>
    %c0_6 = arith.constant 0 : index
    %c0_7 = arith.constant 0 : index
    %9 = vector.load %arg5[%c0_6, %c0_7] : memref<16x128xbf16, #tpu.memory_space<vmem>>, vector<16x128xbf16>
    tpu.vector_store %arg5[%c0_6, %c0_7], %8 {strides = array<i32>} : memref<16x128xbf16, #tpu.memory_space<vmem>>, vector<16x128xbf16>,
    return
  }
  func.func @transform_0(%arg0: i32, %arg1: i32) -> (i32, i32) {
    %c0_i32 = arith.constant 0 : i32
    %c0_i32_0 = arith.constant 0 : i32
    return %arg0, %c0_i32 : i32, i32
  }
  func.func @transform_1(%arg0: i32, %arg1: i32) -> (i32, i32) {
    %c0_i32 = arith.constant 0 : i32
    %c0_i32_0 = arith.constant 0 : i32
    return %c0_i32, %arg1 : i32, i32
  }
  func.func @transform_2(%arg0: i32, %arg1: i32) -> (i32, i32) {
    %c0_i32 = arith.constant 0 : i32
    %c0_i32_0 = arith.constant 0 : i32
    return %c0_i32, %arg1 : i32, i32
  }
  func.func @transform_3(%arg0: i32, %arg1: i32) -> (i32, i32) {
    %c0_i32 = arith.constant 0 : i32
    return %arg0, %arg1 : i32, i32
  }
}

module attributes {stable_mosaic.version = 11 : i64} {
  func.func @_matmul_bias_relu_k1_kernel(%arg0: i32, %arg1: i32, %arg2: memref<16x64xbf16, #tpu.memory_space<vmem>>, %arg3: memref<64x128xbf16, #tpu.memory_space<vmem>>, %arg4: memref<1x128xf32, #tpu.memory_space<vmem>>, %arg5: memref<16x128xbf16, #tpu.memory_space<vmem>>) attributes {dimension_semantics = [#tpu.dimension_semantics<parallel>, #tpu.dimension_semantics<parallel>], iteration_bounds = array<i64: 2, 1>, scalar_prefetch = 0 : i64, scratch_operands = 0 : i64, tpu.core_type = #tpu.core_type<tc>, window_params = [{transform_indices = @transform_0, window_bounds = array<i64: 16, 64>}, {transform_indices = @transform_1, window_bounds = array<i64: 64, 128>}, {transform_indices = @transform_2, window_bounds = array<i64: 1, 128>}, {transform_indices = @transform_3, window_bounds = array<i64: 16, 128>}]} {
    %c0 = arith.constant 0 : index
    %c0_0 = arith.constant 0 : index
    %0 = vector.load %arg2[%c0, %c0_0] : memref<16x64xbf16, #tpu.memory_space<vmem>>, vector<16x64xbf16>
    %c0_1 = arith.constant 0 : index
    %c0_2 = arith.constant 0 : index
    %1 = vector.load %arg3[%c0_1, %c0_2] : memref<64x128xbf16, #tpu.memory_space<vmem>>, vector<64x128xbf16>
    %cst = arith.constant dense<0.000000e+00> : vector<16x128xf32>
    %2 = tpu.matmul %0, %1, %cst {dimension_numbers = #tpu.dot_dimension_numbers<[1], [0], [0], [1], [0, 0, 1, 1], [], []>} : vector<16x64xbf16>, vector<64x128xbf16>, vector<16x128xf32> -> vector<16x128xf32>
    %c0_3 = arith.constant 0 : index
    %c0_4 = arith.constant 0 : index
    %3 = vector.load %arg4[%c0_3, %c0_4] : memref<1x128xf32, #tpu.memory_space<vmem>>, vector<1x128xf32>
    %4 = vector.broadcast %3 : vector<1x128xf32> to vector<16x128xf32>
    %5 = arith.addf %2, %4 : vector<16x128xf32>
    %cst_5 = arith.constant 0.000000e+00 : f32
    %6 = vector.broadcast %cst_5 : f32 to vector<16x128xf32>
    %7 = arith.maximumf %5, %6 : vector<16x128xf32>
    %8 = arith.truncf %7 : vector<16x128xf32> to vector<16x128xbf16>
    %c0_6 = arith.constant 0 : index
    %c0_7 = arith.constant 0 : index
    %9 = vector.load %arg5[%c0_6, %c0_7] : memref<16x128xbf16, #tpu.memory_space<vmem>>, vector<16x128xbf16>
    tpu.vector_store %arg5[%c0_6, %c0_7], %8 {strides = array<i32>} : memref<16x128xbf16, #tpu.memory_space<vmem>>, vector<16x128xbf16>,
    return
  }
  func.func @transform_0(%arg0: i32, %arg1: i32) -> (i32, i32) {
    %c0_i32 = arith.constant 0 : i32
    %c0_i32_0 = arith.constant 0 : i32
    return %arg0, %c0_i32 : i32, i32
  }
  func.func @transform_1(%arg0: i32, %arg1: i32) -> (i32, i32) {
    %c0_i32 = arith.constant 0 : i32
    %c0_i32_0 = arith.constant 0 : i32
    return %c0_i32, %arg1 : i32, i32
  }
  func.func @transform_2(%arg0: i32, %arg1: i32) -> (i32, i32) {
    %c0_i32 = arith.constant 0 : i32
    %c0_i32_0 = arith.constant 0 : i32
    return %c0_i32, %arg1 : i32, i32
  }
  func.func @transform_3(%arg0: i32, %arg1: i32) -> (i32, i32) {
    %c0_i32 = arith.constant 0 : i32
    return %arg0, %arg1 : i32, i32
  }
}

module attributes {stable_mosaic.version = 11 : i64} {
  func.func @_matmul_bias_relu_k1_kernel(%arg0: i32, %arg1: i32, %arg2: memref<64x32xbf16, #tpu.memory_space<vmem>>, %arg3: memref<32x128xbf16, #tpu.memory_space<vmem>>, %arg4: memref<1x128xf32, #tpu.memory_space<vmem>>, %arg5: memref<64x128xf32, #tpu.memory_space<vmem>>) attributes {dimension_semantics = [#tpu.dimension_semantics<parallel>, #tpu.dimension_semantics<parallel>], iteration_bounds = array<i64: 2, 1>, scalar_prefetch = 0 : i64, scratch_operands = 0 : i64, tpu.core_type = #tpu.core_type<tc>, window_params = [{transform_indices = @transform_0, window_bounds = array<i64: 64, 32>}, {transform_indices = @transform_1, window_bounds = array<i64: 32, 128>}, {transform_indices = @transform_2, window_bounds = array<i64: 1, 128>}, {transform_indices = @transform_3, window_bounds = array<i64: 64, 128>}]} {
    %c0 = arith.constant 0 : index
    %c0_0 = arith.constant 0 : index
    %0 = vector.load %arg2[%c0, %c0_0] : memref<64x32xbf16, #tpu.memory_space<vmem>>, vector<64x32xbf16>
    %c0_1 = arith.constant 0 : index
    %c0_2 = arith.constant 0 : index
    %1 = vector.load %arg3[%c0_1, %c0_2] : memref<32x128xbf16, #tpu.memory_space<vmem>>, vector<32x128xbf16>
    %cst = arith.constant dense<0.000000e+00> : vector<64x128xf32>
    %2 = tpu.matmul %0, %1, %cst {dimension_numbers = #tpu.dot_dimension_numbers<[1], [0], [0], [1], [0, 0, 1, 1], [], []>} : vector<64x32xbf16>, vector<32x128xbf16>, vector<64x128xf32> -> vector<64x128xf32>
    %c0_3 = arith.constant 0 : index
    %c0_4 = arith.constant 0 : index
    %3 = vector.load %arg4[%c0_3, %c0_4] : memref<1x128xf32, #tpu.memory_space<vmem>>, vector<1x128xf32>
    %4 = vector.broadcast %3 : vector<1x128xf32> to vector<64x128xf32>
    %5 = arith.addf %2, %4 : vector<64x128xf32>
    %cst_5 = arith.constant 0.000000e+00 : f32
    %6 = vector.broadcast %cst_5 : f32 to vector<64x128xf32>
    %7 = arith.maximumf %5, %6 : vector<64x128xf32>
    %c0_6 = arith.constant 0 : index
    %c0_7 = arith.constant 0 : index
    %8 = vector.load %arg5[%c0_6, %c0_7] : memref<64x128xf32, #tpu.memory_space<vmem>>, vector<64x128xf32>
    tpu.vector_store %arg5[%c0_6, %c0_7], %7 {strides = array<i32>} : memref<64x128xf32, #tpu.memory_space<vmem>>, vector<64x128xf32>,
    return
  }
  func.func @transform_0(%arg0: i32, %arg1: i32) -> (i32, i32) {
    %c0_i32 = arith.constant 0 : i32
    %c0_i32_0 = arith.constant 0 : i32
    return %arg0, %c0_i32 : i32, i32
  }
  func.func @transform_1(%arg0: i32, %arg1: i32) -> (i32, i32) {
    %c0_i32 = arith.constant 0 : i32
    %c0_i32_0 = arith.constant 0 : i32
    return %c0_i32, %arg1 : i32, i32
  }
  func.func @transform_2(%arg0: i32, %arg1: i32) -> (i32, i32) {
    %c0_i32 = arith.constant 0 : i32
    %c0_i32_0 = arith.constant 0 : i32
    return %c0_i32, %arg1 : i32, i32
  }
  func.func @transform_3(%arg0: i32, %arg1: i32) -> (i32, i32) {
    %c0_i32 = arith.constant 0 : i32
    return %arg0, %arg1 : i32, i32
  }
}

</mosaic_0001>

<bundles_post_ra>
// kernel: conv_ae_forward.4
= control target key start
LH: loop header
LB: loop body
LE: loop exit
PB: predicated region body
PF: predicated region fallthrough
CT: control target
= control target key end

     0   :  { %s571_s12 = smov 0   ;;  %s573_s13 = smov 0   ;;  %s610_s0 = inlined_call_operand.vmem [shape: bf16[128,16], index: 0, kind: input, shape index: {}]   ;;  %s611_s1 = inlined_call_operand.vmem [shape: bf16[16,128], index: 1, kind: input, shape index: {}]   ;;  %s612_s2 = inlined_call_operand.vmem [shape: f32[1,128], index: 2, kind: input, shape index: {}]   ;;  %s613_s3 = inlined_call_operand.vmem [shape: bf16[128,128], index: 3, kind: output, shape index: {}]  }
   0x1   :  { %s575_s14 = smov 0  }
   0x2 LB: > { %s25_s15 = sadd.s32 1, %s545_s13  ;;  %p440_p0 = scmp.ge.s32.totalorder %s549_s14, 1  ;;  %s549_s14 = sphi %s575_s14, %s13_s14   ;;  %s545_s13 = sphi %s573_s13, %s615_s13   ;;  %s541_s12 = sphi %s571_s12, %s614_s12  }
   0x3   : > { %p27_p1 = scmp.ge.s32.totalorder %s25_s15, 2  ;;  %p169_p2 = scmp.lt.s32.totalorder %s549_s14, 3 }
   0x5   : > { %s617_s15 = smov (%p27_p1, %s25_s15), 0  ;;  %p170_p3 = pnand %p440_p0, %p169_p2 }
   0x6   : > { %s441_s18 = sshll.u32 (!%p170_p3), %s541_s12, 3 }
   0x7   : > { %173 = sbr.rel (%p170_p3) target bundleno = 165 (0xa5), region = 32  ;;  %p204_p4 = scmp.lt.s32.totalorder (!%p170_p3), %s441_s18, 15 }
   0xc   : > { %v475_v0 = vld [vmem:[%s611_s1] sm:$0xff]  ;;  %s619_s18 = smov (!%p204_p4, %s441_s18), 15  ;;  %vm266_vm0 = vcmask 130048  }
   0xd   : > { %286 = vmatpush.bf16.msra.mxu0 %v475_v0  ;;  %499 = vmatpush.bf16.msra.mxu1 %v475_v0  ;;  %s442_s19 = sshll.u32 %s619_s18, 2  ;;  %v526_v7 = vld [vmem:[%s612_s2] ss:$0 sm:$0xff] }
   0xe   : > { %500 = vmatpush.bf16.msra.mxu2 %v475_v0  ;;  %501 = vmatpush.bf16.msra.mxu3 %v475_v0  ;;  %s207_s22 = scalar_lea.vmem %s610_s0, %s442_s19  ;;  %s223_s27 = scalar_lea.vmem %s613_s3, %s442_s19 }
   0xf   : > { %v471_v1 = vld [vmem:[%s207_s22] sm:$0xff]  ;;  %v472_v2 = vld [vmem:[%s207_s22 + $0x8] sm:$0xff]  ;;  %v473_v3 = vld [vmem:[%s207_s22 + $0x10] sm:$0xff] }
  0x10   : > { %v474_v4 = vld [vmem:[%s207_s22 + $0x18] sm:$0xff]  ;;  %465 = vmatmul.msk.bf16.vlgmr.msra.gmra.mxu0 %vm266_vm0, %v471_v1  ;;  %466 = vmatmul.msk.bf16.vlgmr.msra.gmra.mxu1 %vm266_vm0, %v472_v2 }
  0x11   : > { %467 = vmatmul.msk.bf16.vlgmr.msra.gmra.mxu2 %vm266_vm0, %v473_v3  ;;  %468 = vmatmul.msk.bf16.vlgmr.msra.gmra.mxu3 %vm266_vm0, %v474_v4 }
  0x8d   : > { %v288_v5 = vpop.f32.mrf.mxu0  ;;  %v293_v6 = vpop.f32.mrf.mxu1 }
  0x8e   : > { %v289_v8 = vadd.f32 %v526_v7, %v288_v5  ;;  %v294_v9 = vadd.f32 %v526_v7, %v293_v6 }
  0x90   : > { %v308_v16 = vmax.f32 %v289_v8, 0.0  ;;  %v310_v17 = vmax.f32 %v294_v9, 0.0 }
  0x94   : > { %v298_v10 = vpop.f32.mrf.mxu2  ;;  %v303_v11 = vpop.f32.mrf.mxu3 }
  0x95   : > { %v290_v12 = vpop.f32.mrf.mxu0  ;;  %v295_v13 = vpop.f32.mrf.mxu1  ;;  %v299_v22 = vadd.f32 %v526_v7, %v298_v10  ;;  %v304_v23 = vadd.f32 %v526_v7, %v303_v11 }
  0x96   : > { %v291_v14 = vadd.f32 %v526_v7, %v290_v12  ;;  %v296_v15 = vadd.f32 %v526_v7, %v295_v13 }
  0x97   : > { %v312_v28 = vmax.f32 %v299_v22, 0.0  ;;  %v314_v29 = vmax.f32 %v304_v23, 0.0 }
  0x98   : > { %v309_v18 = vmax.f32 %v291_v14, 0.0  ;;  %v311_v19 = vmax.f32 %v296_v15, 0.0 }
  0x9a   : > { %v479_v20 = vpack.c.bf16 %v309_v18, %v308_v16  ;;  %v484_v21 = vpack.c.bf16 %v311_v19, %v310_v17 }
  0x9c   : > { %480 = vst [vmem:[%s223_s27] sm:$0xff] %v479_v20   ;;  %v300_v24 = vpop.f32.mrf.mxu2  ;;  %v305_v25 = vpop.f32.mrf.mxu3 }
  0x9d   : > { %496 = vst [vmem:[%s223_s27 + $0x8] sm:$0xff] %v484_v21   ;;  %v301_v26 = vadd.f32 %v526_v7, %v300_v24  ;;  %v306_v27 = vadd.f32 %v526_v7, %v305_v25 }
  0x9f   : > { %v313_v30 = vmax.f32 %v301_v26, 0.0  ;;  %v315_v31 = vmax.f32 %v306_v27, 0.0 }
  0xa1   : > { %v489_v32 = vpack.c.bf16 %v313_v30, %v312_v28  ;;  %v494_v33 = vpack.c.bf16 %v315_v31, %v314_v29 }
  0xa3   : > { %497 = vst [vmem:[%s223_s27 + $0x10] sm:$0xff] %v489_v32  }
  0xa4   : > { %498 = vst [vmem:[%s223_s27 + $0x18] sm:$0xff] %v494_v33  }
  0xa5 PF: > { %s13_s14 = sadd.s32 1, %s549_s14   ;;  %s614_s12 = smov %s545_s13 }
  0xa6   : > { %p10_p5 = scmp.ge.s32.totalorder %s13_s14, 4   ;;  %s615_s13 = smov %s617_s15 }
  0xa8   :  { %12 = sbr.rel (!%p10_p5) target bundleno = 2 (0x2), region = 68 }

// kernel: conv_ae_forward.5
= control target key start
LH: loop header
LB: loop body
LE: loop exit
PB: predicated region body
PF: predicated region fallthrough
CT: control target
= control target key end

     0   :  { %s521_s12 = smov 0   ;;  %s523_s13 = smov 0   ;;  %s572_s0 = inlined_call_operand.vmem [shape: bf16[32,80], index: 0, kind: input, shape index: {}]   ;;  %s573_s1 = inlined_call_operand.vmem [shape: bf16[80,128], index: 1, kind: input, shape index: {}]   ;;  %s574_s2 = inlined_call_operand.vmem [shape: f32[1,128], index: 2, kind: input, shape index: {}]   ;;  %s575_s3 = inlined_call_operand.vmem [shape: bf16[32,128], index: 3, kind: output, shape index: {}]  }
   0x1   :  { %s525_s14 = smov 0  }
   0x2 LB: > { %s25_s15 = sadd.s32 1, %s495_s13  ;;  %p409_p0 = scmp.ge.s32.totalorder %s499_s14, 1  ;;  %s499_s14 = sphi %s525_s14, %s13_s14   ;;  %s495_s13 = sphi %s523_s13, %s577_s13   ;;  %s491_s12 = sphi %s521_s12, %s576_s12  }
   0x3   : > { %p27_p1 = scmp.ge.s32.totalorder %s25_s15, 2  ;;  %p169_p2 = scmp.lt.s32.totalorder %s499_s14, 3 }
   0x5   : > { %s579_s15 = smov (%p27_p1, %s25_s15), 0  ;;  %p170_p3 = pnand %p409_p0, %p169_p2 }
   0x6   : > { %s410_s18 = sshll.u32 (!%p170_p3), %s491_s12, 1 }
   0x7   : > { %173 = sbr.rel (%p170_p3) target bundleno = 173 (0xad), region = 32  ;;  %p204_p4 = scmp.lt.s32.totalorder (!%p170_p3), %s410_s18, 3 }
   0xc   : > { %v446_v0 = vld [vmem:[%s573_s1 + $0x20] sm:$0xff]  ;;  %v445_v1 = vld [vmem:[%s573_s1 + $0x18] sm:$0xff]  ;;  %v444_v2 = vld [vmem:[%s573_s1 + $0x10] sm:$0xff]  ;;  %s581_s18 = smov (!%p204_p4, %s410_s18), 3  ;;  %vm277_vm0 = vcmask 654336  }
   0xd   : > { %284 = vmatpush.bf16.msra.mxu0 %v446_v0  ;;  %v443_v3 = vld [vmem:[%s573_s1 + $0x8] sm:$0xff]  ;;  %s411_s25 = sshll.u32 %s581_s18, 2  ;;  %v442_v4 = vld [vmem:[%s573_s1] sm:$0xff] }
   0xe   : > { %s207_s30 = scalar_lea.vmem %s572_s0, %s411_s25  ;;  %v476_v7 = vld [vmem:[%s574_s2] ss:$0 sm:$0xff]  ;;  %s223_s8 = scalar_lea.vmem %s575_s3, %s411_s25 }
   0xf   : > { %v441_v5 = vld [vmem:[%s207_s30] sm:$0xff] }
  0x11   : > { %285 = vmatpush.bf16.msra.mxu0 %v445_v1 }
  0x15   : > { %286 = vmatpush.bf16.msra.mxu0 %v444_v2 }
  0x19   : > { %287 = vmatpush.bf16.msra.mxu0 %v443_v3 }
  0x1d   : > { %288 = vmatpush.bf16.msra.mxu0 %v442_v4 }
  0x20   : > { %438 = vmatmul.msk.bf16.vlgmr.msra.gmra.mxu0 %vm277_vm0, %v441_v5 }
  0x9d   : > { %v290_v6 = vpop.f32.mrf.mxu0 }
  0x9e   : > { %v291_v8 = vadd.f32 %v476_v7, %v290_v6 }
  0xa0   : > { %v295_v11 = vmax.f32 %v291_v8, 0.0 }
  0xa5   : > { %v292_v9 = vpop.f32.mrf.mxu0 }
  0xa6   : > { %v293_v10 = vadd.f32 %v476_v7, %v292_v9 }
  0xa8   : > { %v296_v12 = vmax.f32 %v293_v10, 0.0 }
  0xaa   : > { %v450_v13 = vpack.c.bf16 %v296_v12, %v295_v11 }
  0xac   : > { %451 = vst [vmem:[%s223_s8] sm:$0xff] %v450_v13  }
  0xad PF: > { %s13_s14 = sadd.s32 1, %s499_s14   ;;  %s576_s12 = smov %s495_s13 }
  0xae   : > { %p10_p5 = scmp.ge.s32.totalorder %s13_s14, 4   ;;  %s577_s13 = smov %s579_s15 }
  0xb0   :  { %12 = sbr.rel (!%p10_p5) target bundleno = 2 (0x2), region = 68 }

// kernel: conv_ae_forward.6
= control target key start
LH: loop header
LB: loop body
LE: loop exit
PB: predicated region body
PF: predicated region fallthrough
CT: control target
= control target key end

     0   :  { %s508_s12 = smov 0   ;;  %s510_s13 = smov 0   ;;  %s556_s0 = inlined_call_operand.vmem [shape: bf16[32,64], index: 0, kind: input, shape index: {}]   ;;  %s557_s1 = inlined_call_operand.vmem [shape: bf16[64,128], index: 1, kind: input, shape index: {}]   ;;  %s558_s2 = inlined_call_operand.vmem [shape: f32[1,128], index: 2, kind: input, shape index: {}]   ;;  %s559_s3 = inlined_call_operand.vmem [shape: bf16[32,128], index: 3, kind: output, shape index: {}]  }
   0x1   :  { %s512_s14 = smov 0  }
   0x2 LB: > { %s25_s15 = sadd.s32 1, %s482_s13  ;;  %p401_p0 = scmp.ge.s32.totalorder %s486_s14, 1  ;;  %s486_s14 = sphi %s512_s14, %s13_s14   ;;  %s482_s13 = sphi %s510_s13, %s561_s13   ;;  %s478_s12 = sphi %s508_s12, %s560_s12  }
   0x3   : > { %p27_p1 = scmp.ge.s32.totalorder %s25_s15, 2  ;;  %p169_p2 = scmp.lt.s32.totalorder %s486_s14, 3 }
   0x5   : > { %s563_s15 = smov (%p27_p1, %s25_s15), 0  ;;  %p170_p3 = pnand %p401_p0, %p169_p2 }
   0x6   : > { %s402_s18 = sshll.u32 (!%p170_p3), %s478_s12, 1 }
   0x7   : > { %173 = sbr.rel (%p170_p3) target bundleno = 169 (0xa9), region = 32  ;;  %p204_p4 = scmp.lt.s32.totalorder (!%p170_p3), %s402_s18, 3 }
   0xc   : > { %v433_v0 = vld [vmem:[%s557_s1 + $0x18] sm:$0xff]  ;;  %v432_v1 = vld [vmem:[%s557_s1 + $0x10] sm:$0xff]  ;;  %s565_s18 = smov (!%p204_p4, %s402_s18), 3  ;;  %v431_v2 = vld [vmem:[%s557_s1 + $0x8] sm:$0xff]  ;;  %vm269_vm0 = vcmask 523264  }
   0xd   : > { %277 = vmatpush.bf16.msra.mxu0 %v433_v0  ;;  %s403_s23 = sshll.u32 %s565_s18, 2  ;;  %v430_v3 = vld [vmem:[%s557_s1] sm:$0xff] }
   0xe   : > { %s207_s28 = scalar_lea.vmem %s556_s0, %s403_s23  ;;  %v463_v6 = vld [vmem:[%s558_s2] ss:$0 sm:$0xff]  ;;  %s223_s6 = scalar_lea.vmem %s559_s3, %s403_s23 }
   0xf   : > { %v429_v4 = vld [vmem:[%s207_s28] sm:$0xff] }
  0x11   : > { %278 = vmatpush.bf16.msra.mxu0 %v432_v1 }
  0x15   : > { %279 = vmatpush.bf16.msra.mxu0 %v431_v2 }
  0x19   : > { %280 = vmatpush.bf16.msra.mxu0 %v430_v3 }
  0x1c   : > { %426 = vmatmul.msk.bf16.vlgmr.msra.gmra.mxu0 %vm269_vm0, %v429_v4 }
  0x99   : > { %v282_v5 = vpop.f32.mrf.mxu0 }
  0x9a   : > { %v283_v7 = vadd.f32 %v463_v6, %v282_v5 }
  0x9c   : > { %v287_v10 = vmax.f32 %v283_v7, 0.0 }
  0xa1   : > { %v284_v8 = vpop.f32.mrf.mxu0 }
  0xa2   : > { %v285_v9 = vadd.f32 %v463_v6, %v284_v8 }
  0xa4   : > { %v288_v11 = vmax.f32 %v285_v9, 0.0 }
  0xa6   : > { %v437_v12 = vpack.c.bf16 %v288_v11, %v287_v10 }
  0xa8   : > { %438 = vst [vmem:[%s223_s6] sm:$0xff] %v437_v12  }
  0xa9 PF: > { %s13_s14 = sadd.s32 1, %s486_s14   ;;  %s560_s12 = smov %s482_s13 }
  0xaa   : > { %p10_p5 = scmp.ge.s32.totalorder %s13_s14, 4   ;;  %s561_s13 = smov %s563_s15 }
  0xac   :  { %12 = sbr.rel (!%p10_p5) target bundleno = 2 (0x2), region = 68 }

// kernel: conv_ae_forward.7
= control target key start
LH: loop header
LB: loop body
LE: loop exit
PB: predicated region body
PF: predicated region fallthrough
CT: control target
= control target key end

     0   :  { %s556_s12 = smov 0   ;;  %s558_s13 = smov 0   ;;  %s598_s0 = inlined_call_operand.vmem [shape: bf16[128,32], index: 0, kind: input, shape index: {}]   ;;  %s599_s1 = inlined_call_operand.vmem [shape: bf16[32,128], index: 1, kind: input, shape index: {}]   ;;  %s600_s2 = inlined_call_operand.vmem [shape: f32[1,128], index: 2, kind: input, shape index: {}]   ;;  %s601_s3 = inlined_call_operand.vmem [shape: f32[128,128], index: 3, kind: output, shape index: {}]  }
   0x1   :  { %s560_s14 = smov 0  }
   0x2 LB: > { %s25_s15 = sadd.s32 1, %s530_s13  ;;  %p440_p0 = scmp.ge.s32.totalorder %s534_s14, 1  ;;  %s534_s14 = sphi %s560_s14, %s13_s14   ;;  %s530_s13 = sphi %s558_s13, %s603_s13   ;;  %s526_s12 = sphi %s556_s12, %s602_s12  }
   0x3   : > { %p27_p1 = scmp.ge.s32.totalorder %s25_s15, 2  ;;  %p169_p2 = scmp.lt.s32.totalorder %s534_s14, 3 }
   0x5   : > { %s605_s15 = smov (%p27_p1, %s25_s15), 0  ;;  %p170_p3 = pnand %p440_p0, %p169_p2 }
   0x6   : > { %s441_s18 = sshll.u32 (!%p170_p3), %s526_s12, 3 }
   0x7   : > { %173 = sbr.rel (%p170_p3) target bundleno = 167 (0xa7), region = 32  ;;  %p204_p4 = scmp.lt.s32.totalorder (!%p170_p3), %s441_s18, 15 }
   0xc   : > { %v480_v0 = vld [vmem:[%s599_s1 + $0x8] sm:$0xff]  ;;  %v479_v1 = vld [vmem:[%s599_s1] sm:$0xff]  ;;  %s607_s18 = smov (!%p204_p4, %s441_s18), 15  ;;  %vm274_vm0 = vcmask 261120  }
   0xd   : > { %293 = vmatpush.bf16.msra.mxu0 %v480_v0  ;;  %481 = vmatpush.bf16.msra.mxu1 %v480_v0  ;;  %s442_s21 = sshll.u32 %s607_s18, 2  ;;  %v511_v6 = vld [vmem:[%s600_s2] ss:$0 sm:$0xff]  ;;  %s444_s27 = sshll.u32 %s607_s18, 3 }
   0xe   : > { %482 = vmatpush.bf16.msra.mxu2 %v480_v0  ;;  %483 = vmatpush.bf16.msra.mxu3 %v480_v0  ;;  %s207_s24 = scalar_lea.vmem %s598_s0, %s442_s21  ;;  %s223_s30 = scalar_lea.vmem %s601_s3, %s444_s27 }
   0xf   : > { %v475_v2 = vld [vmem:[%s207_s24] sm:$0xff]  ;;  %v476_v3 = vld [vmem:[%s207_s24 + $0x8] sm:$0xff]  ;;  %v477_v4 = vld [vmem:[%s207_s24 + $0x10] sm:$0xff] }
  0x10   : > { %v478_v5 = vld [vmem:[%s207_s24 + $0x18] sm:$0xff] }
  0x11   : > { %294 = vmatpush.bf16.msra.mxu0 %v479_v1  ;;  %484 = vmatpush.bf16.msra.mxu1 %v479_v1 }
  0x12   : > { %485 = vmatpush.bf16.msra.mxu2 %v479_v1  ;;  %486 = vmatpush.bf16.msra.mxu3 %v479_v1 }
  0x14   : > { %469 = vmatmul.msk.bf16.vlgmr.msra.gmra.mxu0 %vm274_vm0, %v475_v2  ;;  %470 = vmatmul.msk.bf16.vlgmr.msra.gmra.mxu1 %vm274_vm0, %v476_v3 }
  0x15   : > { %471 = vmatmul.msk.bf16.vlgmr.msra.gmra.mxu2 %vm274_vm0, %v477_v4  ;;  %472 = vmatmul.msk.bf16.vlgmr.msra.gmra.mxu3 %vm274_vm0, %v478_v5 }
  0x91   : > { %v296_v7 = vpop.f32.mrf.mxu0  ;;  %v301_v8 = vpop.f32.mrf.mxu1 }
  0x92   : > { %v297_v9 = vadd.f32 %v511_v6, %v296_v7  ;;  %v302_v10 = vadd.f32 %v511_v6, %v301_v8 }
  0x94   : > { %v316_v11 = vmax.f32 %v297_v9, 0.0  ;;  %v318_v12 = vmax.f32 %v302_v10, 0.0 }
  0x96   : > { %324 = vst [vmem:[%s223_s30] sm:$0xff] %v316_v11 }
  0x97   : > { %326 = vst [vmem:[%s223_s30 + $0x10] sm:$0xff] %v318_v12 }
  0x98   : > { %v306_v13 = vpop.f32.mrf.mxu2  ;;  %v311_v14 = vpop.f32.mrf.mxu3 }
  0x99   : > { %v307_v15 = vadd.f32 %v511_v6, %v306_v13  ;;  %v312_v16 = vadd.f32 %v511_v6, %v311_v14  ;;  %v298_v17 = vpop.f32.mrf.mxu0  ;;  %v303_v18 = vpop.f32.mrf.mxu1 }
  0x9a   : > { %v299_v19 = vadd.f32 %v511_v6, %v298_v17  ;;  %v304_v20 = vadd.f32 %v511_v6, %v303_v18 }
  0x9b   : > { %v320_v21 = vmax.f32 %v307_v15, 0.0  ;;  %v322_v22 = vmax.f32 %v312_v16, 0.0 }
  0x9c   : > { %v317_v23 = vmax.f32 %v299_v19, 0.0  ;;  %v319_v24 = vmax.f32 %v304_v20, 0.0 }
  0x9d   : > { %328 = vst [vmem:[%s223_s30 + $0x20] sm:$0xff] %v320_v21 }
  0x9e   : > { %330 = vst [vmem:[%s223_s30 + $0x30] sm:$0xff] %v322_v22 }
  0x9f   : > { %325 = vst [vmem:[%s223_s30 + $0x8] sm:$0xff] %v317_v23 }
  0xa0   : > { %327 = vst [vmem:[%s223_s30 + $0x18] sm:$0xff] %v319_v24  ;;  %v308_v25 = vpop.f32.mrf.mxu2  ;;  %v313_v26 = vpop.f32.mrf.mxu3 }
  0xa1   : > { %v309_v27 = vadd.f32 %v511_v6, %v308_v25  ;;  %v314_v28 = vadd.f32 %v511_v6, %v313_v26 }
  0xa3   : > { %v321_v29 = vmax.f32 %v309_v27, 0.0  ;;  %v323_v30 = vmax.f32 %v314_v28, 0.0 }
  0xa5   : > { %329 = vst [vmem:[%s223_s30 + $0x28] sm:$0xff] %v321_v29 }
  0xa6   : > { %331 = vst [vmem:[%s223_s30 + $0x38] sm:$0xff] %v323_v30 }
  0xa7 PF: > { %s13_s14 = sadd.s32 1, %s534_s14   ;;  %s602_s12 = smov %s530_s13 }
  0xa8   : > { %p10_p5 = scmp.ge.s32.totalorder %s13_s14, 4   ;;  %s603_s13 = smov %s605_s15 }
  0xaa   :  { %12 = sbr.rel (!%p10_p5) target bundleno = 2 (0x2), region = 68 }

</bundles_post_ra>
